<compile_context>
chip_gen: v7x
topology: tpu7x:2x2x1
jax: 0.10.0
libtpu: 0.0.40
codegen_flags: <defaults>
</compile_context>

<pallas_src>
import functools

import jax
import jax.numpy as jnp
from jax.experimental import pallas as pl
from jax.experimental.pallas import tpu as pltpu

EPS = 1e-5

# ------------------------- pltpu.roll convention probe -------------------------

_ROLL_SIGN = None


def _probe_roll_sign():
    """Return +1 if pltpu.roll matches jnp.roll (out[i] = in[i-shift]), else -1."""
    def k(x_ref, o_ref):
        o_ref[...] = pltpu.roll(x_ref[...], 1, axis=0)

    x = jnp.broadcast_to(jnp.arange(8, dtype=jnp.float32)[:, None], (8, 128))
    y = pl.pallas_call(
        k,
        out_shape=jax.ShapeDtypeStruct((8, 128), jnp.float32),
        grid=(1,),
        in_specs=[pl.BlockSpec((8, 128), lambda i: (0, 0))],
        out_specs=pl.BlockSpec((8, 128), lambda i: (0, 0)),
    )(x)
    return 1 if float(y[0, 0]) == 7.0 else -1


def _get_roll_sign():
    global _ROLL_SIGN
    if _ROLL_SIGN is None:
        _ROLL_SIGN = _probe_roll_sign()
    return _ROLL_SIGN


def _pick_divisor(total, target):
    d = min(total, target)
    while total % d:
        d -= 1
    return d


# ----------------------------- Pallas kernels -----------------------------

def _bottleneck_kernel(x_ref, s1_ref, t1_ref, w1_ref, s2_ref, t2_ref,
                       w2_ref, s3_ref, t3_ref, w3_ref, b3_ref,
                       o_ref, *, H, W, P, roll_sign):
    """Fused Bottleneck for one image (HW rows x C lanes).

    BN1/ReLU -> conv1 (1x1 GEMM) -> BN2/ReLU -> conv2 (3x3 via 9 rolled+masked
    GEMM taps, no scratch, no misaligned loads) -> BN3/ReLU -> conv3 (1x1 GEMM)
    -> +residual.  conv1/conv2 biases are pre-folded into t2_ref/t3_ref.
    GEMMs run with bf16 operands and f32 accumulation.
    """
    HW = H * W

    x = x_ref[...]                                                    # (HW, C) f32
    h1 = jnp.maximum(x * s1_ref[...] + t1_ref[...], 0.0)
    a1 = jnp.dot(h1.astype(jnp.bfloat16), w1_ref[...],
                 preferred_element_type=jnp.float32)
    h2 = jnp.maximum(a1 * s2_ref[...] + t2_ref[...], 0.0)             # (HW, P) f32

    # (HW, 1) row / column validity masks for the shifted taps.
    rows = jax.lax.broadcasted_iota(jnp.int32, (HW, 1), 0)
    col = rows % W
    ok_left = col >= 1            # reading column j-1 requires j >= 1
    ok_right = col <= W - 2       # reading column j+1 requires j <= W-2
    ok_top = rows >= W            # reading image row i-1 requires i >= 1
    ok_bot = rows < HW - W        # reading image row i+1 requires i <= H-2

    acc = jnp.zeros((HW, P), jnp.float32)
    t = 0
    for dy in (-1, 0, 1):
        for dx in (-1, 0, 1):
            # tap value at output row r must be h2[r + dy*W + dx]
            k = -(dy * W + dx)                      # jnp.roll shift
            amt = (roll_sign * k) % HW              # pltpu.roll shift (>= 0)
            v = h2 if amt == 0 else pltpu.roll(h2, amt, axis=0)
            m = None
            if dy == -1:
                m = ok_top
            elif dy == 1:
                m = ok_bot
            if dx == -1:
                m = ok_left if m is None else (m & ok_left)
            elif dx == 1:
                m = ok_right if m is None else (m & ok_right)
            if m is not None:
                v = jnp.where(m, v, 0.0)
            acc = acc + jnp.dot(v.astype(jnp.bfloat16), w2_ref[t],
                                preferred_element_type=jnp.float32)
            t += 1

    h3 = jnp.maximum(acc * s3_ref[...] + t3_ref[...], 0.0)            # (HW, P)
    y = jnp.dot(h3.astype(jnp.bfloat16), w3_ref[...],
                preferred_element_type=jnp.float32) + b3_ref[...]
    o_ref[...] = y + x


def _pool_kernel(x_ref, o_ref, *, W2, R_IMG):
    # x_ref: (2*W2*R_IMG, 2C) rows = (image row, j2), lanes = (pj, c)
    # o_ref: (W2*R_IMG, C)
    x = x_ref[...]
    c = x.shape[-1] // 2
    h = jnp.maximum(x[:, :c], x[:, c:])              # horizontal 2:1 max
    for m in range(R_IMG):                           # vertical 2:1 max, chunked
        a = h[(2 * m) * W2:(2 * m + 1) * W2, :]
        b = h[(2 * m + 1) * W2:(2 * m + 2) * W2, :]
        o_ref[m * W2:(m + 1) * W2, :] = jnp.maximum(a, b)


def _upsample_add_kernel(up_ref, lo_ref, o_ref):
    # up_ref/o_ref: (R, 1, W2, 2C)  -- one parity of R high-res rows, lanes (pj, c)
    # lo_ref:       (R, W2, C)      -- the R shared low-res rows
    lo = lo_ref[...]
    lo_h = jnp.concatenate([lo, lo], axis=-1)        # (R, W2, 2C): nearest dup over pj
    o_ref[...] = up_ref[...] + lo_h[:, None, :, :]


# ----------------------------- pallas_call wrappers -----------------------------

def bottleneck_forward(pp, x_flat, n, h, w, planes):
    HW, C, P = h * w, 2 * planes, planes
    kernel = functools.partial(_bottleneck_kernel, H=h, W=w, P=P,
                               roll_sign=_get_roll_sign())
    flops = int(2 * n * HW * (C * P + 9 * P * P + P * C))
    bytes_accessed = int(4 * (2 * n * HW * C + 3 * C + 4 * P)
                         + 2 * (C * P + 9 * P * P + P * C))
    # VMEM budget: double-buffered in/out blocks + ~18 (HW,P) f32 temporaries
    # (h2 + rolled/masked taps + acc/h3) + bf16 weights; capped at v7x physical.
    est = 4 * (4 * HW * C + 18 * HW * P) + 2 * (C * P + 9 * P * P + P * C)
    vmem_limit = int(min(64 << 20, max(32 << 20, 2 * est)))
    return pl.pallas_call(
        kernel,
        out_shape=jax.ShapeDtypeStruct((n * HW, C), jnp.float32),
        grid=(n,),
        in_specs=[
            pl.BlockSpec((HW, C), lambda i: (i, 0)),       # x (per-image block)
            pl.BlockSpec((1, C), lambda i: (0, 0)),        # s1
            pl.BlockSpec((1, C), lambda i: (0, 0)),        # t1
            pl.BlockSpec((C, P), lambda i: (0, 0)),        # w1 (bf16)
            pl.BlockSpec((1, P), lambda i: (0, 0)),        # s2
            pl.BlockSpec((1, P), lambda i: (0, 0)),        # t2 (b1 folded)
            pl.BlockSpec((9, P, P), lambda i: (0, 0, 0)),  # w2 taps (bf16)
            pl.BlockSpec((1, P), lambda i: (0, 0)),        # s3
            pl.BlockSpec((1, P), lambda i: (0, 0)),        # t3 (b2 folded)
            pl.BlockSpec((P, C), lambda i: (0, 0)),        # w3 (bf16)
            pl.BlockSpec((1, C), lambda i: (0, 0)),        # b3
        ],
        out_specs=pl.BlockSpec((HW, C), lambda i: (i, 0)),
        compiler_params=pltpu.CompilerParams(
            dimension_semantics=("parallel",),
            vmem_limit_bytes=vmem_limit),
        cost_estimate=pl.CostEstimate(flops=flops, transcendentals=0,
                                      bytes_accessed=bytes_accessed),
    )(x_flat, pp['s1'], pp['t1'], pp['w1_bf'], pp['s2'], pp['t2p'],
      pp['w2t_bf'], pp['s3'], pp['t3p'], pp['w3_bf'], pp['b3'])


def maxpool2x2(x_flat, n, h, w, ch):
    assert h % 2 == 0 and w % 2 == 0, (h, w)
    h2, w2 = h // 2, w // 2
    # rows = (b, i, j2), lanes = (pj, c)  -- pure metadata reshape
    xv = x_flat.reshape(n * h * w2, 2 * ch)
    total_lo_rows = n * h2
    r_img = _pick_divisor(total_lo_rows, 8)          # low-res image rows per step
    kernel = functools.partial(_pool_kernel, W2=w2, R_IMG=r_img)
    out = pl.pallas_call(
        kernel,
        out_shape=jax.ShapeDtypeStruct((n * h2 * w2, ch), x_flat.dtype),
        grid=(total_lo_rows // r_img,),
        in_specs=[pl.BlockSpec((2 * w2 * r_img, 2 * ch), lambda k: (k, 0))],
        out_specs=pl.BlockSpec((w2 * r_img, ch), lambda k: (k, 0)),
        compiler_params=pltpu.CompilerParams(dimension_semantics=("parallel",)),
    )(xv)
    return out


def upsample2x_add(up1_flat, low3_flat, n, h2, w2, ch):
    # nearest-neighbor x2 (F.interpolate default) + residual add.
    H, W = 2 * h2, 2 * w2
    upv = up1_flat.reshape(n * h2, 2, w2, 2 * ch)    # ((b,i'), pi, j2, (pj,c))
    lov = low3_flat.reshape(n * h2, w2, ch)          # ((b,i'), j2, c)
    r = _pick_divisor(n * h2, 8)                     # low-res rows per grid step
    out = pl.pallas_call(
        _upsample_add_kernel,
        out_shape=jax.ShapeDtypeStruct((n * h2, 2, w2, 2 * ch), jnp.float32),
        grid=(n * h2 // r, 2),
        in_specs=[pl.BlockSpec((r, 1, w2, 2 * ch), lambda k, p: (k, p, 0, 0)),
                  pl.BlockSpec((r, w2, ch), lambda k, p: (k, 0, 0))],
        out_specs=pl.BlockSpec((r, 1, w2, 2 * ch), lambda k, p: (k, p, 0, 0)),
        compiler_params=pltpu.CompilerParams(
            dimension_semantics=("parallel", "parallel")),
    )(upv, lov)
    return out.reshape(n * H * W, ch)


# ----------------------------- parameters -----------------------------

def init_bottleneck(key, planes):
    C, P = planes * 2, planes
    ks = jax.random.split(key, 12)

    def bn_fold(kg, kb, ch):
        gamma = 1.0 + 0.1 * jax.random.normal(kg, (ch,), jnp.float32)
        beta = 0.1 * jax.random.normal(kb, (ch,), jnp.float32)
        running_mean = jnp.zeros((ch,), jnp.float32)
        running_var = jnp.ones((ch,), jnp.float32)
        scale = gamma * jax.lax.rsqrt(running_var + EPS)
        shift = beta - running_mean * scale
        return scale.reshape(1, ch), shift.reshape(1, ch)

    s1, t1 = bn_fold(ks[0], ks[1], C)
    s2, t2 = bn_fold(ks[2], ks[3], P)
    s3, t3 = bn_fold(ks[4], ks[5], P)
    w1 = 0.15 * jax.random.normal(ks[6], (C, P), jnp.float32)          # conv1 1x1 (Cin, Cout)
    b1 = 0.05 * jax.random.normal(ks[7], (1, P), jnp.float32)
    w2 = 0.15 * jax.random.normal(ks[8], (3, 3, P, P), jnp.float32)    # conv2 3x3 HWIO
    b2 = 0.05 * jax.random.normal(ks[9], (1, P), jnp.float32)
    w3 = 0.15 * jax.random.normal(ks[10], (P, C), jnp.float32)         # conv3 1x1 (Cin, Cout)
    b3 = 0.05 * jax.random.normal(ks[11], (1, C), jnp.float32)
    # fold conv biases into the following BN shift (pure pre-fold, eval-mode BN)
    t2p = s2 * b1 + t2
    t3p = s3 * b2 + t3
    w2t = w2.reshape(9, P, P)
    return dict(s1=s1, t1=t1, w1=w1, b1=b1, s2=s2, t2=t2, t2p=t2p,
                w2=w2, b2=b2, s3=s3, t3=t3, t3p=t3p, w3=w3, b3=b3,
                w1_bf=w1.astype(jnp.bfloat16),
                w2t_bf=w2t.astype(jnp.bfloat16),
                w3_bf=w3.astype(jnp.bfloat16))


def init_hourglass(key, num_blocks, planes, depth):
    hg = []
    for i in range(depth):
        n_res = 4 if i == 0 else 3            # innermost level has the extra module
        res_list = []
        for _ in range(n_res):
            blocks = []
            for _ in range(num_blocks):
                key, sub = jax.random.split(key)
                blocks.append(init_bottleneck(sub, planes))
            res_list.append(blocks)
        hg.append(res_list)
    return hg


# ----------------------------- forward (Pallas) -----------------------------

def res_forward(blocks, x_flat, n, h, w, planes):
    for pp in blocks:
        x_flat = bottleneck_forward(pp, x_flat, n, h, w, planes)
    return x_flat


def hourglass_forward(hg, depth_n, x_flat, n, h, w, planes):
    C = 2 * planes
    up1 = res_forward(hg[depth_n - 1][0], x_flat, n, h, w, planes)
    low1 = maxpool2x2(x_flat, n, h, w, C)
    h2, w2 = h // 2, w // 2
    low1 = res_forward(hg[depth_n - 1][1], low1, n, h2, w2, planes)
    if depth_n > 1:
        low2 = hourglass_forward(hg, depth_n - 1, low1, n, h2, w2, planes)
    else:
        low2 = res_forward(hg[depth_n - 1][3], low1, n, h2, w2, planes)
    low3 = res_forward(hg[depth_n - 1][2], low2, n, h2, w2, planes)
    return upsample2x_add(up1, low3, n, h2, w2, C)


# ----------------------------- pure-JAX reference -----------------------------

def _bn_relu_ref(x, scale, shift):
    return jnp.maximum(x * scale.reshape(1, 1, 1, -1) + shift.reshape(1, 1, 1, -1), 0.0)


def bottleneck_ref(pp, x):  # x: (N,H,W,C)
    h = _bn_relu_ref(x, pp['s1'], pp['t1'])
    a = jnp.einsum('nhwc,cp->nhwp', h, pp['w1'],
                   precision=jax.lax.Precision.HIGHEST) + pp['b1'].reshape(1, 1, 1, -1)
    h2 = _bn_relu_ref(a, pp['s2'], pp['t2'])
    a2 = jax.lax.conv_general_dilated(h2, pp['w2'], window_strides=(1, 1), padding='SAME',
                                      dimension_numbers=('NHWC', 'HWIO', 'NHWC'),
                                      precision=jax.lax.Precision.HIGHEST) + pp['b2'].reshape(1, 1, 1, -1)
    h3 = _bn_relu_ref(a2, pp['s3'], pp['t3'])
    y = jnp.einsum('nhwp,pc->nhwc', h3, pp['w3'],
                   precision=jax.lax.Precision.HIGHEST) + pp['b3'].reshape(1, 1, 1, -1)
    return y + x


def maxpool_ref(x):
    return jax.lax.reduce_window(x, -jnp.inf, jax.lax.max, (1, 2, 2, 1), (1, 2, 2, 1), 'VALID')


def hourglass_ref(hg, depth_n, x):
    up1 = x
    for pp in hg[depth_n - 1][0]:
        up1 = bottleneck_ref(pp, up1)
    low1 = maxpool_ref(x)
    for pp in hg[depth_n - 1][1]:
        low1 = bottleneck_ref(pp, low1)
    if depth_n > 1:
        low2 = hourglass_ref(hg, depth_n - 1, low1)
    else:
        low2 = low1
        for pp in hg[depth_n - 1][3]:
            low2 = bottleneck_ref(pp, low2)
    low3 = low2
    for pp in hg[depth_n - 1][2]:
        low3 = bottleneck_ref(pp, low3)
    up2 = jnp.repeat(jnp.repeat(low3, 2, axis=1), 2, axis=2)
    return up1 + up2


# ----------------------------- main -----------------------------

if __name__ == "__main__":
    # Small config consistent with Hourglass(Bottleneck, num_blocks, planes, depth):
    # input channels = planes * Bottleneck.expansion = 2*planes.
    N, planes, H, W = 2, 4, 16, 16
    depth, num_blocks = 2, 1
    C = planes * 2

    _get_roll_sign()   # resolve the pltpu.roll convention once, outside jit

    key = jax.random.PRNGKey(0)
    key, kx = jax.random.split(key)
    x_nchw = jax.random.normal(kx, (N, C, H, W), jnp.float32)   # PyTorch-style NCHW input
    hg_params = init_hourglass(key, num_blocks, planes, depth)

    # NCHW -> NHWC -> flat (N*H*W, C) for the kernels.
    x_nhwc = jnp.transpose(x_nchw, (0, 2, 3, 1))
    x_flat = x_nhwc.reshape(N * H * W, C)

    fwd = jax.jit(lambda params, xf: hourglass_forward(params, depth, xf, N, H, W, planes))
    out_flat = jax.block_until_ready(fwd(hg_params, x_flat))
    out_nchw = out_flat.reshape(N, H, W, C).transpose(0, 3, 1, 2)

    ref_nchw = hourglass_ref(hg_params, depth, x_nhwc).transpose(0, 3, 1, 2)

    assert out_nchw.shape == (N, C, H, W), out_nchw.shape
    err = float(jnp.max(jnp.abs(out_nchw - ref_nchw)))
    # tolerance re-validated for bf16 MXU operands with f32 accumulation
    assert jnp.allclose(out_nchw, ref_nchw, rtol=5e-2, atol=5e-2), f"max abs err {err}"
    print("KERNEL_OK")
</pallas_src>

<mosaic_0001>
module attributes {stable_mosaic.version = 11 : i64} {
  func.func @k(%arg0: i32, %arg1: memref<8x128xf32, #tpu.memory_space<vmem>>, %arg2: memref<8x128xf32, #tpu.memory_space<vmem>>) attributes {dimension_semantics = [#tpu.dimension_semantics<arbitrary>], iteration_bounds = array<i64: 1>, scalar_prefetch = 0 : i64, scratch_operands = 0 : i64, tpu.core_type = #tpu.core_type<tc>, window_params = [{pipeline_mode = #tpu.pipeline_mode<synchronous>, transform_indices = @transform_0, window_bounds = array<i64: 8, 128>}, {pipeline_mode = #tpu.pipeline_mode<synchronous>, transform_indices = @transform_1, window_bounds = array<i64: 8, 128>}]} {
    %c0 = arith.constant 0 : index
    %c0_0 = arith.constant 0 : index
    %0 = vector.load %arg1[%c0, %c0_0] : memref<8x128xf32, #tpu.memory_space<vmem>>, vector<8x128xf32>
    %c1_i32 = arith.constant 1 : i32
    %1 = tpu.dynamic_rotate %0 by %c1_i32 dim 0 : vector<8x128xf32>, i32 -> vector<8x128xf32>
    %c0_1 = arith.constant 0 : index
    %c0_2 = arith.constant 0 : index
    %2 = vector.load %arg2[%c0_1, %c0_2] : memref<8x128xf32, #tpu.memory_space<vmem>>, vector<8x128xf32>
    tpu.vector_store %arg2[%c0_1, %c0_2], %1 {strides = array<i32>} : memref<8x128xf32, #tpu.memory_space<vmem>>, vector<8x128xf32>,
    return
  }
  func.func @transform_0(%arg0: i32) -> (i32, i32) {
    %c0_i32 = arith.constant 0 : i32
    %c0_i32_0 = arith.constant 0 : i32
    %c0_i32_1 = arith.constant 0 : i32
    return %c0_i32, %c0_i32_0 : i32, i32
  }
  func.func @transform_1(%arg0: i32) -> (i32, i32) {
    %c0_i32 = arith.constant 0 : i32
    %c0_i32_0 = arith.constant 0 : i32
    %c0_i32_1 = arith.constant 0 : i32
    return %c0_i32, %c0_i32_0 : i32, i32
  }
}

</mosaic_0001>

<bundles_post_ra>
// kernel: tpu_custom_call.1
= control target key start
LH: loop header
LB: loop body
LE: loop exit
PB: predicated region body
PF: predicated region fallthrough
CT: control target
= control target key end

     0   :  { %6 = vsyncpa [#allocation3], 0  ;;  %s125_s0 = inlined_call_operand.hbm [shape: f32[8,128], index: 0, kind: input, shape index: {}]   ;;  %s126_s1 = inlined_call_operand.hbm [shape: f32[8,128], index: 1, kind: output, shape index: {}]  }
   0x1   :  { %7 = vsyncpa [#allocation4], 0  ;;  %s89_s6 = smov [#allocation2]   ;;  %s41_s10 = scalar_lea.hbm %s125_s0, 128 }
   0x2   :  { %s14_s7 = sshll.u32 %s89_s6, 4  ;;  %p42_p0 = scmp.ne.s32.totalorder %s125_s0, %s41_s10  ;;  %s15_s7 = int_to_ptr.vmem [resolvable:$true] %s14_s7 }
   0x3   :  { %p45_p1 = scmp.lt.u32.totalorder %s41_s10, %s125_s0 }
   0x5   :  { %p47_p2 = pnand %p45_p1, %p42_p0 }
   0x7   :  { %50 = shalt.err (!%p47_p2)
}
   0x8   :  { %s51_s15 = scalar_lea.vmem %s15_s7, 128  ;;  %p56_p4 = scmp.lt.s32.totalorder %s15_s7, %s15_s7 }
   0x9   :  { %p52_p3 = scmp.ne.s32.totalorder %s15_s7, %s51_s15  ;;  %p57_p5 = scmp.lt.s32.totalorder %s51_s15, %s51_s15 }
   0xb   :  { %p58_p6 = por %p57_p5, %p56_p4 }
   0xd   :  { %p59_p7 = pnand %p58_p6, %p52_p3 }
   0xf   :  { %62 = shalt.err (!%p59_p7)
}
  0x10   :  { %17 = dma.hbm_to_vmem [thread:$0]  %s125_s0, 128, %s15_s7, [#allocation3]  }
  0x11   :  { %85 = dma.done.wait [#allocation3], 128  }
  0x12   :  { %86 = vsyncadd [#allocation3], 4294967168  ;;  %s90_s18 = smov [#allocation5]   ;;  %v21_v0 = vld [vmem:[#allocation2] sm:$0xff] }
  0x13   :  { %s30_s19 = sshll.u32 %s90_s18, 4  ;;  %v22_v1 = vrot.slane %v21_v0, 7  ;;  %s31_s19 = int_to_ptr.vmem [resolvable:$true] %s30_s19 }
  0x14   :  { %s63_s20 = scalar_lea.vmem %s31_s19, 128  ;;  %p68_p9 = scmp.lt.s32.totalorder %s31_s19, %s31_s19 }
  0x15   :  { %23 = vst [vmem:[#allocation5] sm:$0xff] %v22_v1  ;;  %p64_p8 = scmp.ne.s32.totalorder %s31_s19, %s63_s20  ;;  %p69_p10 = scmp.lt.s32.totalorder %s63_s20, %s63_s20 }
  0x17   :  { %p70_p11 = por %p69_p10, %p68_p9 }
  0x19   :  { %p71_p12 = pnand %p70_p11, %p64_p8 }
  0x1b   :  { %74 = shalt.err (!%p71_p12)
}
  0x1c   :  { %s75_s23 = scalar_lea.hbm %s126_s1, 128 }
  0x1d   :  { %p76_p13 = scmp.ne.s32.totalorder %s126_s1, %s75_s23  ;;  %p79_p0 = scmp.lt.u32.totalorder %s75_s23, %s126_s1 }
  0x1f   :  { %p81_p1 = pnand %p79_p0, %p76_p13 }
  0x21   :  { %84 = shalt.err (!%p81_p1)
}
  0x22   :  { %33 = dma.vmem_to_hbm [thread:$0]  %s31_s19, 128, %s126_s1, [#allocation4]  }
  0x23   :  { %87 = dma.done.wait [#allocation4], 128  }
  0x24   :  { %88 = vsyncadd [#allocation4], 4294967168 }
  0x25   :  { %37 = vsyncpa [#allocation3], 1 }
  0x26   :  { %38 = vsyncpa [#allocation4], 1 }

</bundles_post_ra>
